<compile_context>
chip_gen: v7x
topology: tpu7x:2x2x1
jax: 0.10.0
libtpu: 0.0.40
codegen_flags: <defaults>
</compile_context>

<pallas_src>
import jax
import jax.numpy as jnp
from jax.experimental import pallas as pl
from jax.experimental.pallas import tpu as pltpu


def _make_i2v_kernel(B, C, nbuf):
    """Pure-DMA permute kernel: HBM->HBM copies with an nbuf-deep ring over batches."""

    def kernel(img_ref, vid_ref, sem):
        # img_ref: (B, T, C, HW)     raw HBM ref
        # vid_ref: (B, C, T, 1, HW)  raw HBM ref
        # sem:     DMA semaphores, shape (nbuf, C)

        def _copy(b, slot, c):
            return pltpu.make_async_copy(
                img_ref.at[b, :, pl.ds(c, 1), :],   # (T, 1, HW), strided source rows
                vid_ref.at[b, c],                   # (T, 1, HW), contiguous destination
                sem.at[slot, c],
            )

        def _start(b, slot):
            for c in range(C):                      # C is small & static -> unrolled
                _copy(b, slot, c).start()

        def _wait(b, slot):
            for c in range(C):
                _copy(b, slot, c).wait()

        # Prime the ring: issue DMAs for the first nbuf batches.
        @pl.loop(0, nbuf)
        def _(b):
            _start(b, b)

        # Steady state: retire batch (b - nbuf), then issue batch b on its slot.
        @pl.loop(nbuf, B)
        def _(b):
            slot = b % nbuf
            _wait(b - nbuf, slot)
            _start(b, slot)

        # Drain: wait for the last nbuf batches' DMAs before the kernel returns.
        @pl.loop(B - nbuf, B)
        def _(b):
            _wait(b, b % nbuf)

    return kernel


def images_to_videos(images, video_frames):
    """images: (B*T, C, H, W) -> videos: (B, C, T, H, W)."""
    assert images.ndim == 4, images.shape
    N, C, H, W = images.shape
    T = int(video_frames)
    assert T > 0
    assert N % T == 0, f"batch {N} not divisible by video_frames {T}"
    B = N // T
    HW = H * W

    # Free reshape: (B*T, C, H, W) -> (B, T, C, H*W).  Lane-density is irrelevant
    # here (no VMEM / vregs involved); collapsing H,W just yields rank-3 DMA views
    # with H*W-byte contiguous segments.
    img = images.reshape(B, T, C, HW)

    # Keep roughly 8 DMAs in flight: nbuf batches x C channels per batch.
    nbuf = max(1, min(B, (8 + C - 1) // C))

    out5 = pl.pallas_call(
        _make_i2v_kernel(B, C, nbuf),
        out_shape=jax.ShapeDtypeStruct((B, C, T, 1, HW), images.dtype),
        in_specs=[pl.BlockSpec(memory_space=pl.ANY)],
        out_specs=pl.BlockSpec(memory_space=pl.ANY),
        scratch_shapes=[pltpu.SemaphoreType.DMA((nbuf, C))],
    )(img)

    # Free reshape back to the reference layout.
    return out5.reshape(B, C, T, H, W)


class ImagesToVideos:
    """Mirror of the PyTorch module: batch of images -> batch of videos."""

    def __init__(self, video_frames=None):
        self.video_frames = video_frames

    def __call__(self, images, video_frames=None):
        if video_frames is None:
            video_frames = self.video_frames
        assert video_frames is not None
        return images_to_videos(images, video_frames)


def _reference(images, video_frames):
    N, C, H, W = images.shape
    B = N // video_frames
    return jnp.transpose(images.reshape(B, video_frames, C, H, W), (0, 2, 1, 3, 4))


if __name__ == "__main__":
    key = jax.random.PRNGKey(0)
    B, C, T, H, W = 2, 4, 4, 16, 16
    images = jax.random.normal(key, (B * T, C, H, W), dtype=jnp.float32)

    mod = ImagesToVideos(video_frames=T)
    out = jax.block_until_ready(mod(images))

    ref = _reference(images, T)
    assert out.shape == (B, C, T, H, W), out.shape
    assert out.dtype == images.dtype
    assert jnp.array_equal(out, ref), "Pallas output mismatch vs reference"

    print("KERNEL_OK")
</pallas_src>

<mosaic_0001>
module attributes {stable_mosaic.version = 11 : i64} {
  func.func @kernel(%arg0: memref<2x4x4x256xf32, #tpu.memory_space<any>>, %arg1: memref<2x4x4x1x256xf32, #tpu.memory_space<any>>, %arg2: memref<2x4x!tpu.dma_semaphore, #tpu.memory_space<semaphore_mem>>) attributes {dimension_semantics = [], scalar_prefetch = 0 : i64, scratch_operands = 1 : i64, tpu.core_type = #tpu.core_type<tc>} {
    %c0_i32 = arith.constant 0 : i32
    %c2_i32 = arith.constant 2 : i32
    %0 = arith.addi %c0_i32, %c2_i32 : i32
    %c1_i32 = arith.constant 1 : i32
    scf.for %arg3 = %c0_i32 to %0 step %c1_i32  : i32 {
      %c1_i32_9 = arith.constant 1 : i32
      %3 = arith.muli %arg3, %c1_i32_9 : i32
      %c0_i32_10 = arith.constant 0 : i32
      %4 = arith.addi %c0_i32_10, %3 : i32
      %c0_i32_11 = arith.constant 0 : i32
      %c0_i32_12 = arith.constant 0 : i32
      %c0_i32_13 = arith.constant 0 : i32
      %c0_i32_14 = arith.constant 0 : i32
      %c0_i32_15 = arith.constant 0 : i32
      %5 = tpu.memref_slice %arg0[%4, %c0_i32_13, %c0_i32_14, %c0_i32_15] : memref<2x4x4x256xf32, #tpu.memory_space<any>> -> memref<1x4x1x256xf32, #tpu.memory_space<any>>
      %6 = tpu.memref_squeeze %5 : memref<1x4x1x256xf32, #tpu.memory_space<any>> -> memref<4x1x256xf32, #tpu.memory_space<any>>
      %c0_i32_16 = arith.constant 0 : i32
      %c0_i32_17 = arith.constant 0 : i32
      %c0_i32_18 = arith.constant 0 : i32
      %7 = tpu.memref_slice %arg1[%4, %c0_i32_11, %c0_i32_16, %c0_i32_17, %c0_i32_18] : memref<2x4x4x1x256xf32, #tpu.memory_space<any>> -> memref<1x1x4x1x256xf32, #tpu.memory_space<any>>
      %8 = tpu.memref_squeeze %7 : memref<1x1x4x1x256xf32, #tpu.memory_space<any>> -> memref<4x1x256xf32, #tpu.memory_space<any>>
      %9 = tpu.memref_slice %arg2[%4, %c0_i32_12] : memref<2x4x!tpu.dma_semaphore, #tpu.memory_space<semaphore_mem>> -> memref<1x1x!tpu.dma_semaphore, #tpu.memory_space<semaphore_mem>>
      %10 = tpu.memref_squeeze %9 : memref<1x1x!tpu.dma_semaphore, #tpu.memory_space<semaphore_mem>> -> memref<!tpu.dma_semaphore, #tpu.memory_space<semaphore_mem>>
      tpu.enqueue_dma source(%6 : memref<4x1x256xf32, #tpu.memory_space<any>>) target(%8 : memref<4x1x256xf32, #tpu.memory_space<any>>) target_semaphore(%10 : memref<!tpu.dma_semaphore, #tpu.memory_space<semaphore_mem>>)
      %c1_i32_19 = arith.constant 1 : i32
      %c1_i32_20 = arith.constant 1 : i32
      %c0_i32_21 = arith.constant 0 : i32
      %c1_i32_22 = arith.constant 1 : i32
      %c0_i32_23 = arith.constant 0 : i32
      %11 = tpu.memref_slice %arg0[%4, %c0_i32_21, %c1_i32_22, %c0_i32_23] : memref<2x4x4x256xf32, #tpu.memory_space<any>> -> memref<1x4x1x256xf32, #tpu.memory_space<any>>
      %12 = tpu.memref_squeeze %11 : memref<1x4x1x256xf32, #tpu.memory_space<any>> -> memref<4x1x256xf32, #tpu.memory_space<any>>
      %c0_i32_24 = arith.constant 0 : i32
      %c0_i32_25 = arith.constant 0 : i32
      %c0_i32_26 = arith.constant 0 : i32
      %13 = tpu.memref_slice %arg1[%4, %c1_i32_19, %c0_i32_24, %c0_i32_25, %c0_i32_26] : memref<2x4x4x1x256xf32, #tpu.memory_space<any>> -> memref<1x1x4x1x256xf32, #tpu.memory_space<any>>
      %14 = tpu.memref_squeeze %13 : memref<1x1x4x1x256xf32, #tpu.memory_space<any>> -> memref<4x1x256xf32, #tpu.memory_space<any>>
      %15 = tpu.memref_slice %arg2[%4, %c1_i32_20] : memref<2x4x!tpu.dma_semaphore, #tpu.memory_space<semaphore_mem>> -> memref<1x1x!tpu.dma_semaphore, #tpu.memory_space<semaphore_mem>>
      %16 = tpu.memref_squeeze %15 : memref<1x1x!tpu.dma_semaphore, #tpu.memory_space<semaphore_mem>> -> memref<!tpu.dma_semaphore, #tpu.memory_space<semaphore_mem>>
      tpu.enqueue_dma source(%12 : memref<4x1x256xf32, #tpu.memory_space<any>>) target(%14 : memref<4x1x256xf32, #tpu.memory_space<any>>) target_semaphore(%16 : memref<!tpu.dma_semaphore, #tpu.memory_space<semaphore_mem>>)
      %c2_i32_27 = arith.constant 2 : i32
      %c2_i32_28 = arith.constant 2 : i32
      %c0_i32_29 = arith.constant 0 : i32
      %c2_i32_30 = arith.constant 2 : i32
      %c0_i32_31 = arith.constant 0 : i32
      %17 = tpu.memref_slice %arg0[%4, %c0_i32_29, %c2_i32_30, %c0_i32_31] : memref<2x4x4x256xf32, #tpu.memory_space<any>> -> memref<1x4x1x256xf32, #tpu.memory_space<any>>
      %18 = tpu.memref_squeeze %17 : memref<1x4x1x256xf32, #tpu.memory_space<any>> -> memref<4x1x256xf32, #tpu.memory_space<any>>
      %c0_i32_32 = arith.constant 0 : i32
      %c0_i32_33 = arith.constant 0 : i32
      %c0_i32_34 = arith.constant 0 : i32
      %19 = tpu.memref_slice %arg1[%4, %c2_i32_27, %c0_i32_32, %c0_i32_33, %c0_i32_34] : memref<2x4x4x1x256xf32, #tpu.memory_space<any>> -> memref<1x1x4x1x256xf32, #tpu.memory_space<any>>
      %20 = tpu.memref_squeeze %19 : memref<1x1x4x1x256xf32, #tpu.memory_space<any>> -> memref<4x1x256xf32, #tpu.memory_space<any>>
      %21 = tpu.memref_slice %arg2[%4, %c2_i32_28] : memref<2x4x!tpu.dma_semaphore, #tpu.memory_space<semaphore_mem>> -> memref<1x1x!tpu.dma_semaphore, #tpu.memory_space<semaphore_mem>>
      %22 = tpu.memref_squeeze %21 : memref<1x1x!tpu.dma_semaphore, #tpu.memory_space<semaphore_mem>> -> memref<!tpu.dma_semaphore, #tpu.memory_space<semaphore_mem>>
      tpu.enqueue_dma source(%18 : memref<4x1x256xf32, #tpu.memory_space<any>>) target(%20 : memref<4x1x256xf32, #tpu.memory_space<any>>) target_semaphore(%22 : memref<!tpu.dma_semaphore, #tpu.memory_space<semaphore_mem>>)
      %c3_i32 = arith.constant 3 : i32
      %c3_i32_35 = arith.constant 3 : i32
      %c0_i32_36 = arith.constant 0 : i32
      %c3_i32_37 = arith.constant 3 : i32
      %c0_i32_38 = arith.constant 0 : i32
      %23 = tpu.memref_slice %arg0[%4, %c0_i32_36, %c3_i32_37, %c0_i32_38] : memref<2x4x4x256xf32, #tpu.memory_space<any>> -> memref<1x4x1x256xf32, #tpu.memory_space<any>>
      %24 = tpu.memref_squeeze %23 : memref<1x4x1x256xf32, #tpu.memory_space<any>> -> memref<4x1x256xf32, #tpu.memory_space<any>>
      %c0_i32_39 = arith.constant 0 : i32
      %c0_i32_40 = arith.constant 0 : i32
      %c0_i32_41 = arith.constant 0 : i32
      %25 = tpu.memref_slice %arg1[%4, %c3_i32, %c0_i32_39, %c0_i32_40, %c0_i32_41] : memref<2x4x4x1x256xf32, #tpu.memory_space<any>> -> memref<1x1x4x1x256xf32, #tpu.memory_space<any>>
      %26 = tpu.memref_squeeze %25 : memref<1x1x4x1x256xf32, #tpu.memory_space<any>> -> memref<4x1x256xf32, #tpu.memory_space<any>>
      %27 = tpu.memref_slice %arg2[%4, %c3_i32_35] : memref<2x4x!tpu.dma_semaphore, #tpu.memory_space<semaphore_mem>> -> memref<1x1x!tpu.dma_semaphore, #tpu.memory_space<semaphore_mem>>
      %28 = tpu.memref_squeeze %27 : memref<1x1x!tpu.dma_semaphore, #tpu.memory_space<semaphore_mem>> -> memref<!tpu.dma_semaphore, #tpu.memory_space<semaphore_mem>>
      tpu.enqueue_dma source(%24 : memref<4x1x256xf32, #tpu.memory_space<any>>) target(%26 : memref<4x1x256xf32, #tpu.memory_space<any>>) target_semaphore(%28 : memref<!tpu.dma_semaphore, #tpu.memory_space<semaphore_mem>>)
    }
    %c2_i32_0 = arith.constant 2 : i32
    %c0_i32_1 = arith.constant 0 : i32
    %c0_i32_2 = arith.constant 0 : i32
    %1 = arith.addi %c0_i32_1, %c0_i32_2 : i32
    %c1_i32_3 = arith.constant 1 : i32
    scf.for %arg3 = %c0_i32_1 to %1 step %c1_i32_3  : i32 {
      %c1_i32_9 = arith.constant 1 : i32
      %3 = arith.muli %arg3, %c1_i32_9 : i32
      %c2_i32_10 = arith.constant 2 : i32
      %4 = arith.addi %c2_i32_10, %3 : i32
      %c2_i32_11 = arith.constant 2 : i32
      %c0_i32_12 = arith.constant 0 : i32
      %5 = arith.cmpi eq, %c2_i32_11, %c0_i32_12 : i32
      %c1_i32_13 = arith.constant 1 : i32
      %6 = arith.select %5, %c1_i32_13, %c2_i32_11 : i32
      %7 = arith.remsi %4, %6 : i32
      %c0_i32_14 = arith.constant 0 : i32
      %8 = arith.cmpi ne, %7, %c0_i32_14 : i32
      %c0_i32_15 = arith.constant 0 : i32
      %9 = arith.cmpi slt, %7, %c0_i32_15 : i32
      %c0_i32_16 = arith.constant 0 : i32
      %10 = arith.cmpi slt, %6, %c0_i32_16 : i32
      %11 = arith.xori %9, %10 : i1
      %12 = arith.andi %11, %8 : i1
      %13 = arith.addi %7, %6 : i32
      %14 = arith.select %12, %13, %7 : i32
      %c2_i32_17 = arith.constant 2 : i32
      %15 = arith.subi %4, %c2_i32_17 : i32
      %c0_i32_18 = arith.constant 0 : i32
      %c0_i32_19 = arith.constant 0 : i32
      %c0_i32_20 = arith.constant 0 : i32
      %c0_i32_21 = arith.constant 0 : i32
      %c0_i32_22 = arith.constant 0 : i32
      %16 = tpu.memref_slice %arg0[%15, %c0_i32_20, %c0_i32_21, %c0_i32_22] : memref<2x4x4x256xf32, #tpu.memory_space<any>> -> memref<1x4x1x256xf32, #tpu.memory_space<any>>
      %17 = tpu.memref_squeeze %16 : memref<1x4x1x256xf32, #tpu.memory_space<any>> -> memref<4x1x256xf32, #tpu.memory_space<any>>
      %c0_i32_23 = arith.constant 0 : i32
      %c0_i32_24 = arith.constant 0 : i32
      %c0_i32_25 = arith.constant 0 : i32
      %18 = tpu.memref_slice %arg1[%15, %c0_i32_18, %c0_i32_23, %c0_i32_24, %c0_i32_25] : memref<2x4x4x1x256xf32, #tpu.memory_space<any>> -> memref<1x1x4x1x256xf32, #tpu.memory_space<any>>
      %19 = tpu.memref_squeeze %18 : memref<1x1x4x1x256xf32, #tpu.memory_space<any>> -> memref<4x1x256xf32, #tpu.memory_space<any>>
      %20 = tpu.memref_slice %arg2[%14, %c0_i32_19] : memref<2x4x!tpu.dma_semaphore, #tpu.memory_space<semaphore_mem>> -> memref<1x1x!tpu.dma_semaphore, #tpu.memory_space<semaphore_mem>>
      %21 = tpu.memref_squeeze %20 : memref<1x1x!tpu.dma_semaphore, #tpu.memory_space<semaphore_mem>> -> memref<!tpu.dma_semaphore, #tpu.memory_space<semaphore_mem>>
      tpu.wait_dma2 semaphore(%21 : memref<!tpu.dma_semaphore, #tpu.memory_space<semaphore_mem>>) src(%17 : memref<4x1x256xf32, #tpu.memory_space<any>>) dst(%19 : memref<4x1x256xf32, #tpu.memory_space<any>>)
      %c1_i32_26 = arith.constant 1 : i32
      %c1_i32_27 = arith.constant 1 : i32
      %c0_i32_28 = arith.constant 0 : i32
      %c1_i32_29 = arith.constant 1 : i32
      %c0_i32_30 = arith.constant 0 : i32
      %22 = tpu.memref_slice %arg0[%15, %c0_i32_28, %c1_i32_29, %c0_i32_30] : memref<2x4x4x256xf32, #tpu.memory_space<any>> -> memref<1x4x1x256xf32, #tpu.memory_space<any>>
      %23 = tpu.memref_squeeze %22 : memref<1x4x1x256xf32, #tpu.memory_space<any>> -> memref<4x1x256xf32, #tpu.memory_space<any>>
      %c0_i32_31 = arith.constant 0 : i32
      %c0_i32_32 = arith.constant 0 : i32
      %c0_i32_33 = arith.constant 0 : i32
      %24 = tpu.memref_slice %arg1[%15, %c1_i32_26, %c0_i32_31, %c0_i32_32, %c0_i32_33] : memref<2x4x4x1x256xf32, #tpu.memory_space<any>> -> memref<1x1x4x1x256xf32, #tpu.memory_space<any>>
      %25 = tpu.memref_squeeze %24 : memref<1x1x4x1x256xf32, #tpu.memory_space<any>> -> memref<4x1x256xf32, #tpu.memory_space<any>>
      %26 = tpu.memref_slice %arg2[%14, %c1_i32_27] : memref<2x4x!tpu.dma_semaphore, #tpu.memory_space<semaphore_mem>> -> memref<1x1x!tpu.dma_semaphore, #tpu.memory_space<semaphore_mem>>
      %27 = tpu.memref_squeeze %26 : memref<1x1x!tpu.dma_semaphore, #tpu.memory_space<semaphore_mem>> -> memref<!tpu.dma_semaphore, #tpu.memory_space<semaphore_mem>>
      tpu.wait_dma2 semaphore(%27 : memref<!tpu.dma_semaphore, #tpu.memory_space<semaphore_mem>>) src(%23 : memref<4x1x256xf32, #tpu.memory_space<any>>) dst(%25 : memref<4x1x256xf32, #tpu.memory_space<any>>)
      %c2_i32_34 = arith.constant 2 : i32
      %c2_i32_35 = arith.constant 2 : i32
      %c0_i32_36 = arith.constant 0 : i32
      %c2_i32_37 = arith.constant 2 : i32
      %c0_i32_38 = arith.constant 0 : i32
      %28 = tpu.memref_slice %arg0[%15, %c0_i32_36, %c2_i32_37, %c0_i32_38] : memref<2x4x4x256xf32, #tpu.memory_space<any>> -> memref<1x4x1x256xf32, #tpu.memory_space<any>>
      %29 = tpu.memref_squeeze %28 : memref<1x4x1x256xf32, #tpu.memory_space<any>> -> memref<4x1x256xf32, #tpu.memory_space<any>>
      %c0_i32_39 = arith.constant 0 : i32
      %c0_i32_40 = arith.constant 0 : i32
      %c0_i32_41 = arith.constant 0 : i32
      %30 = tpu.memref_slice %arg1[%15, %c2_i32_34, %c0_i32_39, %c0_i32_40, %c0_i32_41] : memref<2x4x4x1x256xf32, #tpu.memory_space<any>> -> memref<1x1x4x1x256xf32, #tpu.memory_space<any>>
      %31 = tpu.memref_squeeze %30 : memref<1x1x4x1x256xf32, #tpu.memory_space<any>> -> memref<4x1x256xf32, #tpu.memory_space<any>>
      %32 = tpu.memref_slice %arg2[%14, %c2_i32_35] : memref<2x4x!tpu.dma_semaphore, #tpu.memory_space<semaphore_mem>> -> memref<1x1x!tpu.dma_semaphore, #tpu.memory_space<semaphore_mem>>
      %33 = tpu.memref_squeeze %32 : memref<1x1x!tpu.dma_semaphore, #tpu.memory_space<semaphore_mem>> -> memref<!tpu.dma_semaphore, #tpu.memory_space<semaphore_mem>>
      tpu.wait_dma2 semaphore(%33 : memref<!tpu.dma_semaphore, #tpu.memory_space<semaphore_mem>>) src(%29 : memref<4x1x256xf32, #tpu.memory_space<any>>) dst(%31 : memref<4x1x256xf32, #tpu.memory_space<any>>)
      %c3_i32 = arith.constant 3 : i32
      %c3_i32_42 = arith.constant 3 : i32
      %c0_i32_43 = arith.constant 0 : i32
      %c3_i32_44 = arith.constant 3 : i32
      %c0_i32_45 = arith.constant 0 : i32
      %34 = tpu.memref_slice %arg0[%15, %c0_i32_43, %c3_i32_44, %c0_i32_45] : memref<2x4x4x256xf32, #tpu.memory_space<any>> -> memref<1x4x1x256xf32, #tpu.memory_space<any>>
      %35 = tpu.memref_squeeze %34 : memref<1x4x1x256xf32, #tpu.memory_space<any>> -> memref<4x1x256xf32, #tpu.memory_space<any>>
      %c0_i32_46 = arith.constant 0 : i32
      %c0_i32_47 = arith.constant 0 : i32
      %c0_i32_48 = arith.constant 0 : i32
      %36 = tpu.memref_slice %arg1[%15, %c3_i32, %c0_i32_46, %c0_i32_47, %c0_i32_48] : memref<2x4x4x1x256xf32, #tpu.memory_space<any>> -> memref<1x1x4x1x256xf32, #tpu.memory_space<any>>
      %37 = tpu.memref_squeeze %36 : memref<1x1x4x1x256xf32, #tpu.memory_space<any>> -> memref<4x1x256xf32, #tpu.memory_space<any>>
      %38 = tpu.memref_slice %arg2[%14, %c3_i32_42] : memref<2x4x!tpu.dma_semaphore, #tpu.memory_space<semaphore_mem>> -> memref<1x1x!tpu.dma_semaphore, #tpu.memory_space<semaphore_mem>>
      %39 = tpu.memref_squeeze %38 : memref<1x1x!tpu.dma_semaphore, #tpu.memory_space<semaphore_mem>> -> memref<!tpu.dma_semaphore, #tpu.memory_space<semaphore_mem>>
      tpu.wait_dma2 semaphore(%39 : memref<!tpu.dma_semaphore, #tpu.memory_space<semaphore_mem>>) src(%35 : memref<4x1x256xf32, #tpu.memory_space<any>>) dst(%37 : memref<4x1x256xf32, #tpu.memory_space<any>>)
      %c0_i32_49 = arith.constant 0 : i32
      %c0_i32_50 = arith.constant 0 : i32
      %c0_i32_51 = arith.constant 0 : i32
      %c0_i32_52 = arith.constant 0 : i32
      %c0_i32_53 = arith.constant 0 : i32
      %40 = tpu.memref_slice %arg0[%4, %c0_i32_51, %c0_i32_52, %c0_i32_53] : memref<2x4x4x256xf32, #tpu.memory_space<any>> -> memref<1x4x1x256xf32, #tpu.memory_space<any>>
      %41 = tpu.memref_squeeze %40 : memref<1x4x1x256xf32, #tpu.memory_space<any>> -> memref<4x1x256xf32, #tpu.memory_space<any>>
      %c0_i32_54 = arith.constant 0 : i32
      %c0_i32_55 = arith.constant 0 : i32
      %c0_i32_56 = arith.constant 0 : i32
      %42 = tpu.memref_slice %arg1[%4, %c0_i32_49, %c0_i32_54, %c0_i32_55, %c0_i32_56] : memref<2x4x4x1x256xf32, #tpu.memory_space<any>> -> memref<1x1x4x1x256xf32, #tpu.memory_space<any>>
      %43 = tpu.memref_squeeze %42 : memref<1x1x4x1x256xf32, #tpu.memory_space<any>> -> memref<4x1x256xf32, #tpu.memory_space<any>>
      %44 = tpu.memref_slice %arg2[%14, %c0_i32_50] : memref<2x4x!tpu.dma_semaphore, #tpu.memory_space<semaphore_mem>> -> memref<1x1x!tpu.dma_semaphore, #tpu.memory_space<semaphore_mem>>
      %45 = tpu.memref_squeeze %44 : memref<1x1x!tpu.dma_semaphore, #tpu.memory_space<semaphore_mem>> -> memref<!tpu.dma_semaphore, #tpu.memory_space<semaphore_mem>>
      tpu.enqueue_dma source(%41 : memref<4x1x256xf32, #tpu.memory_space<any>>) target(%43 : memref<4x1x256xf32, #tpu.memory_space<any>>) target_semaphore(%45 : memref<!tpu.dma_semaphore, #tpu.memory_space<semaphore_mem>>)
      %c1_i32_57 = arith.constant 1 : i32
      %c1_i32_58 = arith.constant 1 : i32
      %c0_i32_59 = arith.constant 0 : i32
      %c1_i32_60 = arith.constant 1 : i32
      %c0_i32_61 = arith.constant 0 : i32
      %46 = tpu.memref_slice %arg0[%4, %c0_i32_59, %c1_i32_60, %c0_i32_61] : memref<2x4x4x256xf32, #tpu.memory_space<any>> -> memref<1x4x1x256xf32, #tpu.memory_space<any>>
      %47 = tpu.memref_squeeze %46 : memref<1x4x1x256xf32, #tpu.memory_space<any>> -> memref<4x1x256xf32, #tpu.memory_space<any>>
      %c0_i32_62 = arith.constant 0 : i32
      %c0_i32_63 = arith.constant 0 : i32
      %c0_i32_64 = arith.constant 0 : i32
      %48 = tpu.memref_slice %arg1[%4, %c1_i32_57, %c0_i32_62, %c0_i32_63, %c0_i32_64] : memref<2x4x4x1x256xf32, #tpu.memory_space<any>> -> memref<1x1x4x1x256xf32, #tpu.memory_space<any>>
      %49 = tpu.memref_squeeze %48 : memref<1x1x4x1x256xf32, #tpu.memory_space<any>> -> memref<4x1x256xf32, #tpu.memory_space<any>>
      %50 = tpu.memref_slice %arg2[%14, %c1_i32_58] : memref<2x4x!tpu.dma_semaphore, #tpu.memory_space<semaphore_mem>> -> memref<1x1x!tpu.dma_semaphore, #tpu.memory_space<semaphore_mem>>
      %51 = tpu.memref_squeeze %50 : memref<1x1x!tpu.dma_semaphore, #tpu.memory_space<semaphore_mem>> -> memref<!tpu.dma_semaphore, #tpu.memory_space<semaphore_mem>>
      tpu.enqueue_dma source(%47 : memref<4x1x256xf32, #tpu.memory_space<any>>) target(%49 : memref<4x1x256xf32, #tpu.memory_space<any>>) target_semaphore(%51 : memref<!tpu.dma_semaphore, #tpu.memory_space<semaphore_mem>>)
      %c2_i32_65 = arith.constant 2 : i32
      %c2_i32_66 = arith.constant 2 : i32
      %c0_i32_67 = arith.constant 0 : i32
      %c2_i32_68 = arith.constant 2 : i32
      %c0_i32_69 = arith.constant 0 : i32
      %52 = tpu.memref_slice %arg0[%4, %c0_i32_67, %c2_i32_68, %c0_i32_69] : memref<2x4x4x256xf32, #tpu.memory_space<any>> -> memref<1x4x1x256xf32, #tpu.memory_space<any>>
      %53 = tpu.memref_squeeze %52 : memref<1x4x1x256xf32, #tpu.memory_space<any>> -> memref<4x1x256xf32, #tpu.memory_space<any>>
      %c0_i32_70 = arith.constant 0 : i32
      %c0_i32_71 = arith.constant 0 : i32
      %c0_i32_72 = arith.constant 0 : i32
      %54 = tpu.memref_slice %arg1[%4, %c2_i32_65, %c0_i32_70, %c0_i32_71, %c0_i32_72] : memref<2x4x4x1x256xf32, #tpu.memory_space<any>> -> memref<1x1x4x1x256xf32, #tpu.memory_space<any>>
      %55 = tpu.memref_squeeze %54 : memref<1x1x4x1x256xf32, #tpu.memory_space<any>> -> memref<4x1x256xf32, #tpu.memory_space<any>>
      %56 = tpu.memref_slice %arg2[%14, %c2_i32_66] : memref<2x4x!tpu.dma_semaphore, #tpu.memory_space<semaphore_mem>> -> memref<1x1x!tpu.dma_semaphore, #tpu.memory_space<semaphore_mem>>
      %57 = tpu.memref_squeeze %56 : memref<1x1x!tpu.dma_semaphore, #tpu.memory_space<semaphore_mem>> -> memref<!tpu.dma_semaphore, #tpu.memory_space<semaphore_mem>>
      tpu.enqueue_dma source(%53 : memref<4x1x256xf32, #tpu.memory_space<any>>) target(%55 : memref<4x1x256xf32, #tpu.memory_space<any>>) target_semaphore(%57 : memref<!tpu.dma_semaphore, #tpu.memory_space<semaphore_mem>>)
      %c3_i32_73 = arith.constant 3 : i32
      %c3_i32_74 = arith.constant 3 : i32
      %c0_i32_75 = arith.constant 0 : i32
      %c3_i32_76 = arith.constant 3 : i32
      %c0_i32_77 = arith.constant 0 : i32
      %58 = tpu.memref_slice %arg0[%4, %c0_i32_75, %c3_i32_76, %c0_i32_77] : memref<2x4x4x256xf32, #tpu.memory_space<any>> -> memref<1x4x1x256xf32, #tpu.memory_space<any>>
      %59 = tpu.memref_squeeze %58 : memref<1x4x1x256xf32, #tpu.memory_space<any>> -> memref<4x1x256xf32, #tpu.memory_space<any>>
      %c0_i32_78 = arith.constant 0 : i32
      %c0_i32_79 = arith.constant 0 : i32
      %c0_i32_80 = arith.constant 0 : i32
      %60 = tpu.memref_slice %arg1[%4, %c3_i32_73, %c0_i32_78, %c0_i32_79, %c0_i32_80] : memref<2x4x4x1x256xf32, #tpu.memory_space<any>> -> memref<1x1x4x1x256xf32, #tpu.memory_space<any>>
      %61 = tpu.memref_squeeze %60 : memref<1x1x4x1x256xf32, #tpu.memory_space<any>> -> memref<4x1x256xf32, #tpu.memory_space<any>>
      %62 = tpu.memref_slice %arg2[%14, %c3_i32_74] : memref<2x4x!tpu.dma_semaphore, #tpu.memory_space<semaphore_mem>> -> memref<1x1x!tpu.dma_semaphore, #tpu.memory_space<semaphore_mem>>
      %63 = tpu.memref_squeeze %62 : memref<1x1x!tpu.dma_semaphore, #tpu.memory_space<semaphore_mem>> -> memref<!tpu.dma_semaphore, #tpu.memory_space<semaphore_mem>>
      tpu.enqueue_dma source(%59 : memref<4x1x256xf32, #tpu.memory_space<any>>) target(%61 : memref<4x1x256xf32, #tpu.memory_space<any>>) target_semaphore(%63 : memref<!tpu.dma_semaphore, #tpu.memory_space<semaphore_mem>>)
    }
    %c0_i32_4 = arith.constant 0 : i32
    %c0_i32_5 = arith.constant 0 : i32
    %c2_i32_6 = arith.constant 2 : i32
    %2 = arith.addi %c0_i32_5, %c2_i32_6 : i32
    %c1_i32_7 = arith.constant 1 : i32
    scf.for %arg3 = %c0_i32_5 to %2 step %c1_i32_7  : i32 {
      %c1_i32_9 = arith.constant 1 : i32
      %3 = arith.muli %arg3, %c1_i32_9 : i32
      %c0_i32_10 = arith.constant 0 : i32
      %4 = arith.addi %c0_i32_10, %3 : i32
      %c2_i32_11 = arith.constant 2 : i32
      %c0_i32_12 = arith.constant 0 : i32
      %5 = arith.cmpi eq, %c2_i32_11, %c0_i32_12 : i32
      %c1_i32_13 = arith.constant 1 : i32
      %6 = arith.select %5, %c1_i32_13, %c2_i32_11 : i32
      %7 = arith.remsi %4, %6 : i32
      %c0_i32_14 = arith.constant 0 : i32
      %8 = arith.cmpi ne, %7, %c0_i32_14 : i32
      %c0_i32_15 = arith.constant 0 : i32
      %9 = arith.cmpi slt, %7, %c0_i32_15 : i32
      %c0_i32_16 = arith.constant 0 : i32
      %10 = arith.cmpi slt, %6, %c0_i32_16 : i32
      %11 = arith.xori %9, %10 : i1
      %12 = arith.andi %11, %8 : i1
      %13 = arith.addi %7, %6 : i32
      %14 = arith.select %12, %13, %7 : i32
      %c0_i32_17 = arith.constant 0 : i32
      %c0_i32_18 = arith.constant 0 : i32
      %c0_i32_19 = arith.constant 0 : i32
      %c0_i32_20 = arith.constant 0 : i32
      %c0_i32_21 = arith.constant 0 : i32
      %15 = tpu.memref_slice %arg0[%4, %c0_i32_19, %c0_i32_20, %c0_i32_21] : memref<2x4x4x256xf32, #tpu.memory_space<any>> -> memref<1x4x1x256xf32, #tpu.memory_space<any>>
      %16 = tpu.memref_squeeze %15 : memref<1x4x1x256xf32, #tpu.memory_space<any>> -> memref<4x1x256xf32, #tpu.memory_space<any>>
      %c0_i32_22 = arith.constant 0 : i32
      %c0_i32_23 = arith.constant 0 : i32
      %c0_i32_24 = arith.constant 0 : i32
      %17 = tpu.memref_slice %arg1[%4, %c0_i32_17, %c0_i32_22, %c0_i32_23, %c0_i32_24] : memref<2x4x4x1x256xf32, #tpu.memory_space<any>> -> memref<1x1x4x1x256xf32, #tpu.memory_space<any>>
      %18 = tpu.memref_squeeze %17 : memref<1x1x4x1x256xf32, #tpu.memory_space<any>> -> memref<4x1x256xf32, #tpu.memory_space<any>>
      %19 = tpu.memref_slice %arg2[%14, %c0_i32_18] : memref<2x4x!tpu.dma_semaphore, #tpu.memory_space<semaphore_mem>> -> memref<1x1x!tpu.dma_semaphore, #tpu.memory_space<semaphore_mem>>
      %20 = tpu.memref_squeeze %19 : memref<1x1x!tpu.dma_semaphore, #tpu.memory_space<semaphore_mem>> -> memref<!tpu.dma_semaphore, #tpu.memory_space<semaphore_mem>>
      tpu.wait_dma2 semaphore(%20 : memref<!tpu.dma_semaphore, #tpu.memory_space<semaphore_mem>>) src(%16 : memref<4x1x256xf32, #tpu.memory_space<any>>) dst(%18 : memref<4x1x256xf32, #tpu.memory_space<any>>)
      %c1_i32_25 = arith.constant 1 : i32
      %c1_i32_26 = arith.constant 1 : i32
      %c0_i32_27 = arith.constant 0 : i32
      %c1_i32_28 = arith.constant 1 : i32
      %c0_i32_29 = arith.constant 0 : i32
      %21 = tpu.memref_slice %arg0[%4, %c0_i32_27, %c1_i32_28, %c0_i32_29] : memref<2x4x4x256xf32, #tpu.memory_space<any>> -> memref<1x4x1x256xf32, #tpu.memory_space<any>>
      %22 = tpu.memref_squeeze %21 : memref<1x4x1x256xf32, #tpu.memory_space<any>> -> memref<4x1x256xf32, #tpu.memory_space<any>>
      %c0_i32_30 = arith.constant 0 : i32
      %c0_i32_31 = arith.constant 0 : i32
      %c0_i32_32 = arith.constant 0 : i32
      %23 = tpu.memref_slice %arg1[%4, %c1_i32_25, %c0_i32_30, %c0_i32_31, %c0_i32_32] : memref<2x4x4x1x256xf32, #tpu.memory_space<any>> -> memref<1x1x4x1x256xf32, #tpu.memory_space<any>>
      %24 = tpu.memref_squeeze %23 : memref<1x1x4x1x256xf32, #tpu.memory_space<any>> -> memref<4x1x256xf32, #tpu.memory_space<any>>
      %25 = tpu.memref_slice %arg2[%14, %c1_i32_26] : memref<2x4x!tpu.dma_semaphore, #tpu.memory_space<semaphore_mem>> -> memref<1x1x!tpu.dma_semaphore, #tpu.memory_space<semaphore_mem>>
      %26 = tpu.memref_squeeze %25 : memref<1x1x!tpu.dma_semaphore, #tpu.memory_space<semaphore_mem>> -> memref<!tpu.dma_semaphore, #tpu.memory_space<semaphore_mem>>
      tpu.wait_dma2 semaphore(%26 : memref<!tpu.dma_semaphore, #tpu.memory_space<semaphore_mem>>) src(%22 : memref<4x1x256xf32, #tpu.memory_space<any>>) dst(%24 : memref<4x1x256xf32, #tpu.memory_space<any>>)
      %c2_i32_33 = arith.constant 2 : i32
      %c2_i32_34 = arith.constant 2 : i32
      %c0_i32_35 = arith.constant 0 : i32
      %c2_i32_36 = arith.constant 2 : i32
      %c0_i32_37 = arith.constant 0 : i32
      %27 = tpu.memref_slice %arg0[%4, %c0_i32_35, %c2_i32_36, %c0_i32_37] : memref<2x4x4x256xf32, #tpu.memory_space<any>> -> memref<1x4x1x256xf32, #tpu.memory_space<any>>
      %28 = tpu.memref_squeeze %27 : memref<1x4x1x256xf32, #tpu.memory_space<any>> -> memref<4x1x256xf32, #tpu.memory_space<any>>
      %c0_i32_38 = arith.constant 0 : i32
      %c0_i32_39 = arith.constant 0 : i32
      %c0_i32_40 = arith.constant 0 : i32
      %29 = tpu.memref_slice %arg1[%4, %c2_i32_33, %c0_i32_38, %c0_i32_39, %c0_i32_40] : memref<2x4x4x1x256xf32, #tpu.memory_space<any>> -> memref<1x1x4x1x256xf32, #tpu.memory_space<any>>
      %30 = tpu.memref_squeeze %29 : memref<1x1x4x1x256xf32, #tpu.memory_space<any>> -> memref<4x1x256xf32, #tpu.memory_space<any>>
      %31 = tpu.memref_slice %arg2[%14, %c2_i32_34] : memref<2x4x!tpu.dma_semaphore, #tpu.memory_space<semaphore_mem>> -> memref<1x1x!tpu.dma_semaphore, #tpu.memory_space<semaphore_mem>>
      %32 = tpu.memref_squeeze %31 : memref<1x1x!tpu.dma_semaphore, #tpu.memory_space<semaphore_mem>> -> memref<!tpu.dma_semaphore, #tpu.memory_space<semaphore_mem>>
      tpu.wait_dma2 semaphore(%32 : memref<!tpu.dma_semaphore, #tpu.memory_space<semaphore_mem>>) src(%28 : memref<4x1x256xf32, #tpu.memory_space<any>>) dst(%30 : memref<4x1x256xf32, #tpu.memory_space<any>>)
      %c3_i32 = arith.constant 3 : i32
      %c3_i32_41 = arith.constant 3 : i32
      %c0_i32_42 = arith.constant 0 : i32
      %c3_i32_43 = arith.constant 3 : i32
      %c0_i32_44 = arith.constant 0 : i32
      %33 = tpu.memref_slice %arg0[%4, %c0_i32_42, %c3_i32_43, %c0_i32_44] : memref<2x4x4x256xf32, #tpu.memory_space<any>> -> memref<1x4x1x256xf32, #tpu.memory_space<any>>
      %34 = tpu.memref_squeeze %33 : memref<1x4x1x256xf32, #tpu.memory_space<any>> -> memref<4x1x256xf32, #tpu.memory_space<any>>
      %c0_i32_45 = arith.constant 0 : i32
      %c0_i32_46 = arith.constant 0 : i32
      %c0_i32_47 = arith.constant 0 : i32
      %35 = tpu.memref_slice %arg1[%4, %c3_i32, %c0_i32_45, %c0_i32_46, %c0_i32_47] : memref<2x4x4x1x256xf32, #tpu.memory_space<any>> -> memref<1x1x4x1x256xf32, #tpu.memory_space<any>>
      %36 = tpu.memref_squeeze %35 : memref<1x1x4x1x256xf32, #tpu.memory_space<any>> -> memref<4x1x256xf32, #tpu.memory_space<any>>
      %37 = tpu.memref_slice %arg2[%14, %c3_i32_41] : memref<2x4x!tpu.dma_semaphore, #tpu.memory_space<semaphore_mem>> -> memref<1x1x!tpu.dma_semaphore, #tpu.memory_space<semaphore_mem>>
      %38 = tpu.memref_squeeze %37 : memref<1x1x!tpu.dma_semaphore, #tpu.memory_space<semaphore_mem>> -> memref<!tpu.dma_semaphore, #tpu.memory_space<semaphore_mem>>
      tpu.wait_dma2 semaphore(%38 : memref<!tpu.dma_semaphore, #tpu.memory_space<semaphore_mem>>) src(%34 : memref<4x1x256xf32, #tpu.memory_space<any>>) dst(%36 : memref<4x1x256xf32, #tpu.memory_space<any>>)
    }
    %c2_i32_8 = arith.constant 2 : i32
    return
  }
}

</mosaic_0001>

<bundles_post_ra>
// kernel: tpu_custom_call.1
= control target key start
LH: loop header
LB: loop body
LE: loop exit
PB: predicated region body
PF: predicated region fallthrough
CT: control target
= control target key end

     0   :  { %s378_s6 = smov 0   ;;  %s420_s0 = inlined_call_operand.hbm [shape: f32[2,4,4,256], index: 0, kind: input, shape index: {}]   ;;  %s421_s1 = inlined_call_operand.hbm [shape: f32[2,4,4,1,256], index: 1, kind: output, shape index: {}]  }
   0x1 LB: > { %s304_s7 = sshll.u32 %s354_s6, 9  ;;  %s273_s8 = sshll.u32 %s354_s6, 2  ;;  %s354_s6 = sphi %s378_s6, %s11_s6  }
   0x2   : > { %s388_s11 = scalar_lea.hbm %s420_s0, %s304_s7  ;;  %s393_s14 = scalar_lea.hbm %s421_s1, %s304_s7 }
   0x3   : > { %s360_s15 = smov 64   ;;  %s361_s16 = smov 16  }
   0x4   : > { %31 = sst [smem:[#allocation4]] %s360_s15  ;;  %s362_s17 = smov 1  }
   0x5   : > { %33 = sst [smem:[#allocation4 + $0x1]] %s361_s16  ;;  %s397_s18 = scalar_lea.sflag [#allocation2], %s273_s8 }
   0x6   : > { %35 = sst [smem:[#allocation4 + $0x2]] %s362_s17  ;;  %s363_s19 = smov [#allocation3]  }
   0x7   : > { %s364_s20 = smov 0   ;;  %s219_s21 = scalar_lea.hbm %s388_s11, 16 }
   0x8   : > { %37 = dma.general %s388_s11, 128, %s393_s14, %s397_s18, %s363_s19, [#allocation4], %s364_s20, 0  }
   0x9   : > { %s223_s22 = scalar_lea.hbm %s393_s14, 128  ;;  %58 = sst [smem:[#allocation6]] %s360_s15 }
   0xa   : > { %s226_s23 = scalar_lea.sflag %s397_s18, 1 [#allocation2]  ;;  %60 = sst [smem:[#allocation6 + $0x1]] %s361_s16 }
   0xb   : > { %62 = sst [smem:[#allocation6 + $0x2]] %s362_s17  ;;  %s230_s24 = scalar_lea.hbm %s388_s11, 32 }
   0xc   : > { %s234_s25 = scalar_lea.hbm %s393_s14, 256  ;;  %s237_s26 = scalar_lea.sflag %s397_s18, 2 [#allocation2] }
   0xd   : > { %s241_s27 = scalar_lea.hbm %s388_s11, 48  ;;  %s365_s28 = smov [#allocation5]  }
   0xe   : > { %64 = dma.general %s219_s21, 128, %s223_s22, %s226_s23, %s365_s28, [#allocation6], %s364_s20, 0  }
   0xf   : > { %85 = sst [smem:[#allocation8]] %s360_s15  ;;  %s245_s29 = scalar_lea.hbm %s393_s14, 384 }
  0x10   : > { %87 = sst [smem:[#allocation8 + $0x1]] %s361_s16  ;;  %s248_s30 = scalar_lea.sflag %s397_s18, 3 [#allocation2] }
  0x11   : > { %89 = sst [smem:[#allocation8 + $0x2]] %s362_s17  ;;  %s366_s2 = smov [#allocation7]  }
  0x12   : > { %91 = dma.general %s230_s24, 128, %s234_s25, %s237_s26, %s366_s2, [#allocation8], %s364_s20, 0  }
  0x13   : > { %112 = sst [smem:[#allocation10]] %s360_s15  ;;  %s367_s3 = smov [#allocation9]  }
  0x14   : > { %114 = sst [smem:[#allocation10 + $0x1]] %s361_s16  ;;  %s11_s6 = sadd.s32 1, %s354_s6  }
  0x15   : > { %116 = sst [smem:[#allocation10 + $0x2]] %s362_s17  ;;  %p8_p0 = scmp.ge.s32.totalorder %s11_s6, 2  }
  0x16   : > { %118 = dma.general %s241_s27, 128, %s245_s29, %s248_s30, %s367_s3, [#allocation10], %s364_s20, 0  }
  0x17   :  { %10 = sbr.rel (!%p8_p0) target bundleno = 1 (0x1), region = 57  ;;  %s356_s4 = smov (%p8_p0), 0  }
  0x1e LB: > { %p125_p1 = scmp.lt.s32.totalorder %s358_s4, 0  ;;  %s126_s5 = ssub.s32 0, %s358_s4  ;;  %s358_s4 = sphi %s356_s4, %s124_s4  }
  0x1f   : > { %s289_s7 = smin.u32 %s358_s4, %s126_s5 }
  0x20   : > { %s128_s8 = sand.u32 1, %s289_s7  }
  0x21   : > { %s129_s9 = ssub.s32 0, %s128_s8 }
  0x22   : > { %s423_s9 = smov (!%p125_p1, %s129_s9), %s128_s8 }
  0x23   : > { %p291_p2 = scmp.lt.s32.totalorder %s423_s9, 0  ;;  %s135_s10 = sadd.s32 2, %s423_s9 }
  0x25   : > { %s425_s10 = smov (!%p291_p2, %s135_s10), %s423_s9 }
  0x26   : > { %s292_s11 = sshll.u32 %s425_s10, 2 }
  0x27   : > { %s138_s12 = scalar_lea.sflag [#allocation2], %s292_s11 }
  0x28   : > { %344 = dma.done.wait %s138_s12, 128 }
  0x29   : > { %345 = vsyncadd %s138_s12, 4294967168  ;;  %s253_s13 = scalar_lea.sflag %s138_s12, 1 [#allocation2] }
  0x2a   : > { %346 = dma.done.wait %s253_s13, 128 }
  0x2b   : > { %347 = vsyncadd %s253_s13, 4294967168  ;;  %s256_s0 = scalar_lea.sflag %s138_s12, 2 [#allocation2] }
  0x2c   : > { %348 = dma.done.wait %s256_s0, 128 }
  0x2d   : > { %349 = vsyncadd %s256_s0, 4294967168  ;;  %s259_s1 = scalar_lea.sflag %s138_s12, 3 [#allocation2] }
  0x2e   : > { %350 = dma.done.wait %s259_s1, 128 }
  0x2f   : > { %351 = vsyncadd %s259_s1, 4294967168  ;;  %s124_s4 = sadd.s32 1, %s358_s4  }
  0x30   : > { %p121_p3 = scmp.ge.s32.totalorder %s124_s4, 2  }
  0x32   :  { %123 = sbr.rel (!%p121_p3) target bundleno = 30 (0x1e), region = 68 }
  0x39   :  { %155 = vsyncmov [#allocation2] }
  0x3c   :  { %s156_s6 = vpop.sfrf %155 }
  0x3d   :  { %p296_p4 = scmp.ne.s32.totalorder %s156_s6, 0 }
  0x3f   :  { %160 = shalt.err (%p296_p4)  }
  0x40   :  { %162 = vsyncmov [#allocation2 + $0x1] }
  0x43   :  { %s163_s14 = vpop.sfrf %162 }
  0x44   :  { %p297_p5 = scmp.ne.s32.totalorder %s163_s14, 0 }
  0x46   :  { %167 = shalt.err (%p297_p5)  }
  0x47   :  { %169 = vsyncmov [#allocation2 + $0x2] }
  0x4a   :  { %s170_s15 = vpop.sfrf %169 }
  0x4b   :  { %p298_p6 = scmp.ne.s32.totalorder %s170_s15, 0 }
  0x4d   :  { %174 = shalt.err (%p298_p6)  }
  0x4e   :  { %176 = vsyncmov [#allocation2 + $0x3] }
  0x51   :  { %s177_s16 = vpop.sfrf %176 }
  0x52   :  { %p299_p7 = scmp.ne.s32.totalorder %s177_s16, 0 }
  0x54   :  { %181 = shalt.err (%p299_p7)  }
  0x55   :  { %183 = vsyncmov [#allocation2 + $0x4] }
  0x58   :  { %s184_s17 = vpop.sfrf %183 }
  0x59   :  { %p300_p8 = scmp.ne.s32.totalorder %s184_s17, 0 }
  0x5b   :  { %188 = shalt.err (%p300_p8)  }
  0x5c   :  { %190 = vsyncmov [#allocation2 + $0x5] }
  0x5f   :  { %s191_s18 = vpop.sfrf %190 }
  0x60   :  { %p301_p9 = scmp.ne.s32.totalorder %s191_s18, 0 }
  0x62   :  { %195 = shalt.err (%p301_p9)  }
  0x63   :  { %197 = vsyncmov [#allocation2 + $0x6] }
  0x66   :  { %s198_s19 = vpop.sfrf %197 }
  0x67   :  { %p302_p10 = scmp.ne.s32.totalorder %s198_s19, 0 }
  0x69   :  { %202 = shalt.err (%p302_p10)  }
  0x6a   :  { %204 = vsyncmov [#allocation2 + $0x7] }
  0x6d   :  { %s205_s20 = vpop.sfrf %204 }
  0x6e   :  { %p303_p11 = scmp.ne.s32.totalorder %s205_s20, 0 }
  0x70   :  { %209 = shalt.err (%p303_p11)  }

</bundles_post_ra>
